<compile_context>
chip_gen: v7x
topology: tpu7x:2x2x1
jax: 0.10.0
libtpu: 0.0.40
codegen_flags: <defaults>
</compile_context>

<pallas_src>
import math

import jax
import jax.numpy as jnp
import numpy as np
from jax.experimental import pallas as pl
from jax.experimental.pallas import tpu as pltpu

# ----------------------------------------------------------------------------
# Module constants (from __init__)
# ----------------------------------------------------------------------------
CONCENTRATION = 50.0
UNIFORM_MIX = 0.85
SENSOR_X = -5.0
SENSOR_Y = 0.0
LOG_2PI = math.log(2.0 * math.pi)
UNIFORM_DENSITY = 1.0 / (2.0 * math.pi)


def _log_i0(x: float) -> float:
    # Mirrors torch.distributions.von_mises._log_modified_bessel_fn (order 0)
    # large-x branch (x >= 3.75), which applies for x = 50.
    coef_large = [0.39894228, 0.01328592, 0.00225319, -0.00157565,
                  0.00916281, -0.02057706, 0.02635537, -0.01647633, 0.00392377]
    y = 3.75 / x
    poly = 0.0
    for c in reversed(coef_large):
        poly = poly * y + c
    return x - 0.5 * math.log(x) + math.log(poly)


LOG_I0_CONC = _log_i0(CONCENTRATION)


# ----------------------------------------------------------------------------
# Shared elementwise math (VPU/EUP only, no MXU work)
# ----------------------------------------------------------------------------
def _vonmises_mixture_probs(px, py, loc, logw):
    cos_loc = jnp.cos(loc)
    sin_loc = jnp.sin(loc)

    dx = px - SENSOR_X
    dy = py - SENSOR_Y
    r2 = dx * dx + dy * dy
    nonzero = r2 > 0.0
    # rsqrt on a guarded argument: r2==0 lanes never see 0 -> no inf/NaN; the
    # select below reproduces torch's atan2(0,0)=0 -> cos(0 - loc) = cos(loc).
    inv_r = jax.lax.rsqrt(jnp.where(nonzero, r2, 1.0))
    cos_diff = jnp.where(nonzero, (dx * cos_loc + dy * sin_loc) * inv_r, cos_loc)

    # Von Mises log prob: k*cos(value - loc) - log(2*pi) - log(I0(k))
    log_probs = CONCENTRATION * cos_diff - LOG_2PI - LOG_I0_CONC
    probs = jnp.exp(log_probs) * UNIFORM_MIX + (1.0 - UNIFORM_MIX) * UNIFORM_DENSITY

    if logw is not None:
        # Matches torch (exp without max-subtraction); result is L1-normalized.
        probs = probs * jnp.exp(logw)
    return probs


# ----------------------------------------------------------------------------
# Kernels
# ----------------------------------------------------------------------------
def _make_batch_kernel(has_logw: bool):
    # p_ref: [rows, tb, N]  (row0=x, row1=y, row2=loc, optional row3=logw)
    # out_ref: [tb, N]
    def kernel(p_ref, out_ref):
        logw = p_ref[3, :, :] if has_logw else None
        probs = _vonmises_mixture_probs(p_ref[0, :, :], p_ref[1, :, :],
                                        p_ref[2, :, :], logw)
        # F.normalize(p=1, dim=1, eps=1e-8): w / max(sum(|w|), eps); w > 0.
        denom = jnp.maximum(jnp.sum(probs, axis=1, keepdims=True), 1e-8)
        out_ref[...] = probs * pl.reciprocal(denom, approx=False)

    return kernel


def _make_ntile_kernel(has_logw: bool, tn: int):
    # Grid over N tiles ("arbitrary" axis).  Output block [B, N] stays
    # VMEM-resident across the whole grid; per-row denom accumulates in
    # scratch; normalization happens on the last step (P3 init/finalize).
    def kernel(p_ref, out_ref, denom_ref):
        n = pl.program_id(0)

        @pl.when(n == 0)
        def _():
            denom_ref[...] = jnp.zeros_like(denom_ref)

        logw = p_ref[3, :, :] if has_logw else None
        probs = _vonmises_mixture_probs(p_ref[0, :, :], p_ref[1, :, :],
                                        p_ref[2, :, :], logw)

        start = pl.multiple_of(n * tn, 128)
        out_ref[:, pl.ds(start, tn)] = probs
        denom_ref[...] += jnp.sum(probs, axis=1, keepdims=True)

        @pl.when(n == pl.num_programs(0) - 1)
        def _():
            inv = pl.reciprocal(jnp.maximum(denom_ref[...], 1e-8), approx=False)
            out_ref[...] = out_ref[...] * inv

    return kernel


# ----------------------------------------------------------------------------
# Tiling heuristics
# ----------------------------------------------------------------------------
_BLOCK_BUDGET_BYTES = 8 * 1024 * 1024   # safe on v5e 16 MiB scoped / v7x 32 MiB


def _choose_tile_b(B: int, N: int, rows: int) -> int:
    per_b_bytes = (rows + 1) * N * 4 * 2          # inputs + output, double-buffered
    tb = min(B, max(8, _BLOCK_BUDGET_BYTES // max(per_b_bytes, 1)))
    tb = max(8, (tb // 8) * 8)                    # f32 sublane tiling
    # Never collapse the grid: keep >= 2 steps (>= 4 for large B) so v7x's two
    # TensorCores both get work and input DMA overlaps compute on 1-TC chips.
    target_steps = 4 if B >= 64 else 2
    cap = max(8, ((B // target_steps) // 8) * 8)
    return min(tb, cap)


def _choose_tile_n(B: int, N: int, rows: int):
    # Pick the largest lane-aligned divisor of N that keeps the double-buffered
    # input block small and yields >= 4 (else >= 2) grid steps.
    if N % 128 != 0 or N < 256:
        return None
    budget = 4 * 1024 * 1024
    m = N // 128
    best_ge4 = None
    best_ge2 = None
    for d in range(1, m):                          # proper divisors -> >= 2 steps
        if m % d != 0:
            continue
        tn = d * 128
        if rows * B * tn * 4 * 2 > budget:
            continue
        steps = N // tn
        if steps >= 4 and (best_ge4 is None or tn > best_ge4):
            best_ge4 = tn
        if steps >= 2 and (best_ge2 is None or tn > best_ge2):
            best_ge2 = tn
    return best_ge4 if best_ge4 is not None else best_ge2


# ----------------------------------------------------------------------------
# Wrapper
# ----------------------------------------------------------------------------
def bearings_only_true_weight_model(input_dict):
    particles = input_dict["particles"].astype(jnp.float32)            # [B, N, D]
    logw = input_dict.get("unnormalized_resampled_particle_log_weights")
    # encoded_observations only feeds dead code (bearing_obs) -> not read.

    B, N, D = particles.shape
    assert D >= 2, "particles must carry (x, y, ..., loc) with loc as last dim"

    # Pack ONLY the rows the kernel reads (x, y, loc, optional logw) into one
    # SoA tensor [rows, B, N] with a single fused stack/transpose.
    rows_list = [particles[..., 0], particles[..., 1], particles[..., -1]]
    if logw is not None:
        rows_list.append(logw.astype(jnp.float32))
    packed = jnp.stack(rows_list, axis=0)                               # [rows, B, N]
    rows = packed.shape[0]
    has_logw = logw is not None

    n_transc = 5 if has_logw else 4                 # cos, sin, rsqrt, exp(, exp)
    cost = pl.CostEstimate(
        flops=int(15 * B * N),
        transcendentals=int(n_transc * B * N),
        bytes_accessed=int((rows + 1) * B * N * 4),
    )
    out_shape = jax.ShapeDtypeStruct((B, N), jnp.float32)

    # ---- Path 1: batch-tiled (B large enough for 8-row tiles + >=2 steps) ----
    if B >= 16 and rows * 8 * N * 4 * 2 <= _BLOCK_BUDGET_BYTES:
        tb = _choose_tile_b(B, N, rows)
        return pl.pallas_call(
            _make_batch_kernel(has_logw),
            out_shape=out_shape,
            grid=(pl.cdiv(B, tb),),
            in_specs=[pl.BlockSpec((rows, tb, N), lambda b: (0, b, 0))],
            out_specs=pl.BlockSpec((tb, N), lambda b: (b, 0)),
            compiler_params=pltpu.CompilerParams(
                dimension_semantics=("parallel",)),
            cost_estimate=cost,
        )(packed)

    # ---- Path 2: N-tiled (B small, N large & lane-tileable) ----
    tn = _choose_tile_n(B, N, rows)
    if tn is not None and B * N * 4 <= 16 * 1024 * 1024:
        return pl.pallas_call(
            _make_ntile_kernel(has_logw, tn),
            out_shape=out_shape,
            grid=(N // tn,),
            in_specs=[pl.BlockSpec((rows, B, tn), lambda n: (0, 0, n))],
            out_specs=pl.BlockSpec((B, N), lambda n: (0, 0)),
            scratch_shapes=[pltpu.VMEM((B, 1), jnp.float32)],
            compiler_params=pltpu.CompilerParams(
                dimension_semantics=("arbitrary",)),
            cost_estimate=cost,
        )(packed)

    # ---- Path 3: single-block fallback (tiny problems / ragged N) ----
    # TODO(synk): huge B*N that fits neither path needs a two-pass
    #             (unnormalized-write + rescale) variant.
    return pl.pallas_call(
        _make_batch_kernel(has_logw),
        out_shape=out_shape,
        grid=(1,),
        in_specs=[pl.BlockSpec((rows, B, N), lambda b: (0, 0, 0))],
        out_specs=pl.BlockSpec((B, N), lambda b: (0, 0)),
        compiler_params=pltpu.CompilerParams(
            dimension_semantics=("arbitrary",)),
        cost_estimate=cost,
    )(packed)


# ----------------------------------------------------------------------------
# Pure-JAX reference (mirrors the PyTorch forward)
# ----------------------------------------------------------------------------
def _reference(particles, logw):
    diff = particles[..., 0:2] - jnp.array([SENSOR_X, SENSOR_Y], jnp.float32)
    true_bearings = jnp.arctan2(diff[..., 1], diff[..., 0])
    loc = particles[..., -1]
    log_probs = CONCENTRATION * jnp.cos(true_bearings - loc) - LOG_2PI - LOG_I0_CONC
    probs = jnp.exp(log_probs) * UNIFORM_MIX + (1.0 - UNIFORM_MIX) * UNIFORM_DENSITY
    w = probs if logw is None else probs * jnp.exp(logw)
    denom = jnp.maximum(jnp.sum(jnp.abs(w), axis=1, keepdims=True), 1e-8)
    return w / denom


def _run_case(key, B, N, D, with_logw):
    k1, k2, k3 = jax.random.split(key, 3)
    particles = jax.random.normal(k1, (B, N, D), jnp.float32) * 2.0
    encoded_observations = jax.random.normal(k2, (B, 2), jnp.float32)
    logw = (jax.random.normal(k3, (B, N), jnp.float32) * 0.1) if with_logw else None

    out = bearings_only_true_weight_model({
        "particles": particles,
        "encoded_observations": encoded_observations,
        "unnormalized_resampled_particle_log_weights": logw,
    })
    out = jax.block_until_ready(out)

    ref = _reference(particles, logw)
    assert out.shape == (B, N)
    np.testing.assert_allclose(np.asarray(out), np.asarray(ref),
                               rtol=1e-3, atol=1e-6)
    np.testing.assert_allclose(np.asarray(out).sum(axis=1), np.ones(B),
                               rtol=1e-3, atol=1e-3)


if __name__ == "__main__":
    key = jax.random.PRNGKey(0)
    ks = jax.random.split(key, 4)

    # Single-block path (B=2, N=128), with and without log-weights.
    _run_case(ks[0], B=2, N=128, D=4, with_logw=True)
    _run_case(ks[1], B=2, N=128, D=4, with_logw=False)
    # N-tiled path (B small, N lane-tileable -> grid over N, resident output).
    _run_case(ks[2], B=2, N=512, D=4, with_logw=True)
    # Batch-tiled path (B=16 -> tb=8, 2 "parallel" grid steps).
    _run_case(ks[3], B=16, N=256, D=4, with_logw=True)

    print("KERNEL_OK")
</pallas_src>

<mosaic_0001>
module attributes {stable_mosaic.version = 11 : i64} {
  func.func @kernel(%arg0: i32, %arg1: memref<4x2x128xf32, #tpu.memory_space<vmem>>, %arg2: memref<2x128xf32, #tpu.memory_space<vmem>>) attributes {dimension_semantics = [#tpu.dimension_semantics<arbitrary>], iteration_bounds = array<i64: 1>, scalar_prefetch = 0 : i64, scratch_operands = 0 : i64, tpu.core_type = #tpu.core_type<tc>, window_params = [{pipeline_mode = #tpu.pipeline_mode<synchronous>, transform_indices = @transform_0, window_bounds = array<i64: 4, 2, 128>}, {pipeline_mode = #tpu.pipeline_mode<synchronous>, transform_indices = @transform_1, window_bounds = array<i64: 2, 128>}]} {
    %c3 = arith.constant 3 : index
    %c0 = arith.constant 0 : index
    %c0_0 = arith.constant 0 : index
    %0 = vector.load %arg1[%c3, %c0, %c0_0] : memref<4x2x128xf32, #tpu.memory_space<vmem>>, vector<1x2x128xf32>
    %1 = vector.shape_cast %0 : vector<1x2x128xf32> to vector<2x128xf32>
    %c0_1 = arith.constant 0 : index
    %c0_2 = arith.constant 0 : index
    %c0_3 = arith.constant 0 : index
    %2 = vector.load %arg1[%c0_1, %c0_2, %c0_3] : memref<4x2x128xf32, #tpu.memory_space<vmem>>, vector<1x2x128xf32>
    %3 = vector.shape_cast %2 : vector<1x2x128xf32> to vector<2x128xf32>
    %c1 = arith.constant 1 : index
    %c0_4 = arith.constant 0 : index
    %c0_5 = arith.constant 0 : index
    %4 = vector.load %arg1[%c1, %c0_4, %c0_5] : memref<4x2x128xf32, #tpu.memory_space<vmem>>, vector<1x2x128xf32>
    %5 = vector.shape_cast %4 : vector<1x2x128xf32> to vector<2x128xf32>
    %c2 = arith.constant 2 : index
    %c0_6 = arith.constant 0 : index
    %c0_7 = arith.constant 0 : index
    %6 = vector.load %arg1[%c2, %c0_6, %c0_7] : memref<4x2x128xf32, #tpu.memory_space<vmem>>, vector<1x2x128xf32>
    %7 = vector.shape_cast %6 : vector<1x2x128xf32> to vector<2x128xf32>
    %8 = math.cos %7 : vector<2x128xf32>
    %9 = math.sin %7 : vector<2x128xf32>
    %cst = arith.constant -5.000000e+00 : f32
    %10 = vector.broadcast %cst : f32 to vector<2x128xf32>
    %11 = arith.subf %3, %10 : vector<2x128xf32>
    %cst_8 = arith.constant 0.000000e+00 : f32
    %12 = vector.broadcast %cst_8 : f32 to vector<2x128xf32>
    %13 = arith.subf %5, %12 : vector<2x128xf32>
    %14 = arith.mulf %11, %11 : vector<2x128xf32>
    %15 = arith.mulf %13, %13 : vector<2x128xf32>
    %16 = arith.addf %14, %15 : vector<2x128xf32>
    %cst_9 = arith.constant 0.000000e+00 : f32
    %17 = vector.broadcast %cst_9 : f32 to vector<2x128xf32>
    %18 = arith.cmpf ogt, %16, %17 : vector<2x128xf32>
    %cst_10 = arith.constant 1.000000e+00 : f32
    %19 = vector.broadcast %cst_10 : f32 to vector<2x128xf32>
    %20 = arith.select %18, %16, %19 : vector<2x128xi1>, vector<2x128xf32>
    %21 = math.rsqrt %20 : vector<2x128xf32>
    %22 = arith.mulf %11, %8 : vector<2x128xf32>
    %23 = arith.mulf %13, %9 : vector<2x128xf32>
    %24 = arith.addf %22, %23 : vector<2x128xf32>
    %25 = arith.mulf %24, %21 : vector<2x128xf32>
    %26 = arith.select %18, %25, %8 : vector<2x128xi1>, vector<2x128xf32>
    %cst_11 = arith.constant 5.000000e+01 : f32
    %27 = vector.broadcast %cst_11 : f32 to vector<2x128xf32>
    %28 = arith.mulf %27, %26 : vector<2x128xf32>
    %cst_12 = arith.constant 1.83787704 : f32
    %29 = vector.broadcast %cst_12 : f32 to vector<2x128xf32>
    %30 = arith.subf %28, %29 : vector<2x128xf32>
    %cst_13 = arith.constant 47.1275749 : f32
    %31 = vector.broadcast %cst_13 : f32 to vector<2x128xf32>
    %32 = arith.subf %30, %31 : vector<2x128xf32>
    %33 = math.exp %32 : vector<2x128xf32>
    %cst_14 = arith.constant 8.500000e-01 : f32
    %34 = vector.broadcast %cst_14 : f32 to vector<2x128xf32>
    %35 = arith.mulf %33, %34 : vector<2x128xf32>
    %cst_15 = arith.constant 0.0238732416 : f32
    %36 = vector.broadcast %cst_15 : f32 to vector<2x128xf32>
    %37 = arith.addf %35, %36 : vector<2x128xf32>
    %38 = math.exp %1 : vector<2x128xf32>
    %39 = arith.mulf %37, %38 : vector<2x128xf32>
    %cst_16 = arith.constant dense<0.000000e+00> : vector<2xf32>
    %40 = vector.multi_reduction <add>, %39, %cst_16 [1] : vector<2x128xf32> to vector<2xf32>
    %41 = vector.shape_cast %40 : vector<2xf32> to vector<2x1xf32>
    %cst_17 = arith.constant 9.99999993E-9 : f32
    %42 = vector.broadcast %cst_17 : f32 to vector<2x1xf32>
    %43 = arith.maximumf %41, %42 : vector<2x1xf32>
    %44 = tpu.reciprocal %43 : vector<2x1xf32> -> vector<2x1xf32>
    %45 = vector.broadcast %44 : vector<2x1xf32> to vector<2x128xf32>
    %46 = arith.mulf %39, %45 : vector<2x128xf32>
    %c0_18 = arith.constant 0 : index
    %c0_19 = arith.constant 0 : index
    %47 = vector.load %arg2[%c0_18, %c0_19] : memref<2x128xf32, #tpu.memory_space<vmem>>, vector<2x128xf32>
    tpu.vector_store %arg2[%c0_18, %c0_19], %46 {strides = array<i32>} : memref<2x128xf32, #tpu.memory_space<vmem>>, vector<2x128xf32>,
    return
  }
  func.func @transform_0(%arg0: i32) -> (i32, i32, i32) {
    %c0_i32 = arith.constant 0 : i32
    %c0_i32_0 = arith.constant 0 : i32
    %c0_i32_1 = arith.constant 0 : i32
    %c0_i32_2 = arith.constant 0 : i32
    return %c0_i32, %c0_i32_0, %c0_i32_1 : i32, i32, i32
  }
  func.func @transform_1(%arg0: i32) -> (i32, i32) {
    %c0_i32 = arith.constant 0 : i32
    %c0_i32_0 = arith.constant 0 : i32
    %c0_i32_1 = arith.constant 0 : i32
    return %c0_i32, %c0_i32_0 : i32, i32
  }
}

</mosaic_0001>

<bundles_post_ra>
// kernel: tpu_custom_call.1
= control target key start
LH: loop header
LB: loop body
LE: loop exit
PB: predicated region body
PF: predicated region fallthrough
CT: control target
= control target key end

     0   :  { %6 = vsyncpa [#allocation3], 0  ;;  %s434_s0 = inlined_call_operand.hbm [shape: f32[4,2,128], index: 0, kind: input, shape index: {}]   ;;  %s435_s1 = inlined_call_operand.hbm [shape: f32[2,128], index: 1, kind: output, shape index: {}]  }
   0x1   :  { %7 = vsyncpa [#allocation4], 0  ;;  %s367_s6 = smov [#allocation2]   ;;  %s319_s10 = scalar_lea.hbm %s434_s0, 128 }
   0x2   :  { %s13_s7 = sshll.u32 %s367_s6, 4  ;;  %p320_p0 = scmp.ne.s32.totalorder %s434_s0, %s319_s10  ;;  %s14_s7 = int_to_ptr.vmem [resolvable:$true] %s13_s7 }
   0x3   :  { %p323_p1 = scmp.lt.u32.totalorder %s319_s10, %s434_s0 }
   0x5   :  { %p325_p2 = pnand %p323_p1, %p320_p0 }
   0x7   :  { %328 = shalt.err (!%p325_p2)
}
   0x8   :  { %s329_s15 = scalar_lea.vmem %s14_s7, 128  ;;  %p334_p4 = scmp.lt.s32.totalorder %s14_s7, %s14_s7 }
   0x9   :  { %p330_p3 = scmp.ne.s32.totalorder %s14_s7, %s329_s15  ;;  %p335_p5 = scmp.lt.s32.totalorder %s329_s15, %s329_s15 }
   0xb   :  { %p336_p6 = por %p335_p5, %p334_p4 }
   0xd   :  { %p337_p7 = pnand %p336_p6, %p330_p3 }
   0xf   :  { %340 = shalt.err (!%p337_p7)
}
  0x10   :  { %s368_s16 = smov 32   ;;  %s369_s17 = smov 2  }
  0x11   :  { %19 = dma.hbm_to_vmem [thread:$0]  %s434_s0, 128, %s14_s7, [#allocation3], %s368_s16, %s368_s16, %s369_s17  }
  0x12   :  { %363 = dma.done.wait [#allocation3], 128  }
  0x13   :  { %364 = vsyncadd [#allocation3], 4294967168  ;;  %v399_v0 = vld [vmem:[#allocation2 + $0x4] sm:$0x3]  ;;  %v370_v12 = vmov 683565275  }
  0x14   :  { %v33_v1 = vand.u32 2139095040, %v399_v0  ;;  %v30_v3 = vand.u32 2147483647, %v399_v0  ;;  %v371_v14 = vmov 2475754826   ;;  %vm32_vm7 = vcmp.lt.s32.totalorder %v399_v0, 0 }
  0x15   :  { %v372_v16 = vmov 2131351028   ;;  %v373_v18 = vmov 2102212464   ;;  %v374_v20 = vmov 920167782  }
  0x16   :  { %v34_v2 = vshrl.u32 %v33_v1, 23  ;;  %v37_v6 = vand.u32 8388607, %v30_v3  ;;  %v375_v27 = vmov 1326507024   ;;  %s376_s0 = smov [#allocation5]  }
  0x17   :  { %vm31_vm8 = vcmp.le.f32.partialorder %v30_v3, 0.7853982  ;;  %s273_s20 = sshll.u32 %s376_s0, 4  ;;  %s274_s20 = int_to_ptr.vmem [resolvable:$true] %s273_s20 }
  0x18   :  { %v282_v4 = vadd.s32 4294967169, %v34_v2  ;;  %v38_v9 = vor.u32 8388608, %v37_v6  ;;  %s341_s21 = scalar_lea.vmem %s274_s20, 32  ;;  %p346_p9 = scmp.lt.s32.totalorder %s274_s20, %s274_s20 }
  0x19   :  { %p342_p8 = scmp.ne.s32.totalorder %s274_s20, %s341_s21  ;;  %p347_p10 = scmp.lt.s32.totalorder %s341_s21, %s341_s21 }
  0x1a   :  { %v40_v5 = vadd.s32 1, %v282_v4  ;;  %v78_v29 = vshll.u32 %v38_v9, 8 }
  0x1b   :  { %p348_p11 = por %p347_p10, %p346_p9 }
  0x1c   :  { %vm41_vm0 = vcmp.gt.s32.totalorder %v40_v5, 0 }
  0x1d   :  { %v42_v7 = vsel %vm41_vm0, %v40_v5, 0  ;;  %vm122_vm0 = vweird.f32 %v399_v0  ;;  %p349_p12 = pnand %p348_p11, %p342_p8 }
  0x1e   :  { %v44_v8 = vand.u32 31, %v42_v7  ;;  %v43_v10 = vshrl.u32 %v42_v7, 5 }
  0x20   :  { %v45_v11 = vsub.s32 32, %v44_v8  ;;  %v47_v13 = vshll.u32 %v370_v12, %v44_v8  ;;  %v50_v15 = vshll.u32 %v371_v14, %v44_v8  ;;  %v53_v17 = vshll.u32 %v372_v16, %v44_v8 }
  0x21   :  { %v56_v19 = vshll.u32 %v373_v18, %v44_v8  ;;  %v59_v21 = vshll.u32 %v374_v20, %v44_v8  ;;  %vm62_vm1 = vcmp.lt.s32.totalorder %v43_v10, 1  ;;  %vm65_vm2 = vcmp.lt.s32.totalorder %v43_v10, 4  ;;  %v25_v8 = vld [vmem:[#allocation2] sm:$0x3] }
  0x22   :  { %v46_v22 = vshrl.u32 %v370_v12, %v45_v11  ;;  %v48_v23 = vshrl.u32 %v371_v14, %v45_v11  ;;  %v51_v24 = vshrl.u32 %v372_v16, %v45_v11  ;;  %v54_v25 = vshrl.u32 %v373_v18, %v45_v11  ;;  %v27_v14 = vld [vmem:[#allocation2 + $0x2] sm:$0x3] }
  0x23   :  { %v57_v26 = vshrl.u32 %v374_v20, %v45_v11  ;;  %v60_v28 = vshrl.u32 %v375_v27, %v45_v11  ;;  %vm63_vm3 = vcmp.lt.s32.totalorder %v43_v10, 2  ;;  %vm64_vm4 = vcmp.lt.s32.totalorder %v43_v10, 3 }
  0x24   :  { %v49_v30 = vor.u32 %v48_v23, %v47_v13  ;;  %v52_v31 = vor.u32 %v51_v24, %v50_v15  ;;  %v55_v32 = vor.u32 %v54_v25, %v53_v17  ;;  %v290_v13 = vadd.f32 5.0, %v25_v8 }
  0x25   :  { %v58_v33 = vor.u32 %v57_v26, %v56_v19  ;;  %v61_v34 = vor.u32 %v60_v28, %v59_v21  ;;  %v239_v19 = vmul.f32 %v27_v14, %v27_v14 }
  0x26   :  { %v66_v35 = vsel %vm62_vm1, %v46_v22, %v49_v30  ;;  %v67_v36 = vsel %vm65_vm2, %v55_v32, 2102212464  ;;  %v70_v37 = vsel %vm62_vm1, %v49_v30, %v52_v31  ;;  %v74_v38 = vsel %vm62_vm1, %v52_v31, %v55_v32 }
  0x27   :  { %v68_v39 = vsel %vm64_vm4, %v52_v31, %v67_v36  ;;  %v71_v40 = vsel %vm65_vm2, %v58_v33, 920167782  ;;  %v75_v41 = vsel %vm65_vm2, %v61_v34, 1326507024  ;;  %v238_v18 = vmul.f32 %v290_v13, %v290_v13 }
  0x28   :  { %v72_v42 = vsel %vm64_vm4, %v55_v32, %v71_v40  ;;  %v76_v43 = vsel %vm64_vm4, %v58_v33, %v75_v41  ;;  %v69_v44 = vsel %vm63_vm3, %v66_v35, %v68_v39  ;;  %vm259_vm1 = vcmask 1041408  }
  0x29   :  { %v73_v45 = vsel %vm63_vm3, %v70_v37, %v72_v42  ;;  %v77_v46 = vsel %vm63_vm3, %v74_v38, %v76_v43  ;;  %v85_v51 = vmul.u32 %v78_v29, %v69_v44  ;;  %v240_v23 = vadd.f32 %v239_v19, %v238_v18 }
  0x2a   :  { %v405_v47 = vmul.u32.u64.low %v78_v29, %v77_v46  ;;  %v406_v48 = vmul.u32.u64.high %v78_v29, %v77_v46, %v405_v47  ;;  %v408_v49 = vmul.u32.u64.low %v78_v29, %v73_v45  ;;  %v409_v50 = vmul.u32.u64.high %v78_v29, %v73_v45, %v408_v49 }
  0x2b   :  { %vm241_vm9 = vcmp.gt.f32.partialorder %v240_v23, 0.0 }
  0x2c   :  { %vm87_vm5 = vc.u32 %v406_v48, %v408_v49  ;;  %v88_v52 = vadd.s32 1, %v409_v50  ;;  %v86_v63 = vadd.s32 %v408_v49, %v406_v48  ;;  %v242_v27 = vsel %vm241_vm9, %v240_v23, 1.0  ;;  %v24_v49 = vld [vmem:[#allocation2 + $0x6] sm:$0x3] }
  0x2e   :  { %v89_v53 = vsel %vm87_vm5, %v88_v52, %v409_v50 }
  0x2f   :  { %v90_v54 = vadd.s32 %v89_v53, %v85_v51  ;;  %v256_v51 = vmul.f32 1.442695, %v24_v49 }
  0x31   :  { %v91_v55 = vadd.s32 536870912, %v90_v54 }
  0x33   :  { %v92_v56 = vshrl.u32 %v91_v55, 30 }
  0x35   :  { %v93_v57 = vshll.u32 %v92_v56, 30  ;;  %v116_v16 = vsub.s32 4, %v92_v56 }
  0x37   :  { %v94_v58 = vsub.s32 %v90_v54, %v93_v57  ;;  %v117_v21 = vsel %vm32_vm7, %v116_v16, %v92_v56 }
  0x38   :  { %v119_v25 = vsel %vm31_vm8, 0, %v117_v21 }
  0x39   :  { %v96_v59 = vsub.s32 0, %v94_v58  ;;  %v226_v26 = vadd.s32 3, %v119_v25  ;;  %v123_v28 = vand.u32 3, %v119_v25 }
  0x3b   :  { %v283_v60 = vmin.u32 %v96_v59, %v94_v58  ;;  %v227_v29 = vand.u32 3, %v226_v26  ;;  %vm128_vm10 = vcmp.eq.s32.totalorder %v123_v28, 2  ;;  %vm125_vm12 = vcmp.eq.s32.totalorder %v123_v28, 0 }
  0x3c   :  { %vm124_vm14 = vcmp.lt.s32.totalorder %v123_v28, 2 }
  0x3d   :  { %v98_v61 = vclz %v283_v60  ;;  %vm232_vm11 = vcmp.eq.s32.totalorder %v227_v29, 2  ;;  %vm229_vm13 = vcmp.eq.s32.totalorder %v227_v29, 0  ;;  %vm228_vm15 = vcmp.lt.s32.totalorder %v227_v29, 2 }
  0x3f   :  { %v284_v62 = vadd.s32 4294967294, %v98_v61 }
  0x41   :  { %vm285_vm6 = vcmp.lt.s32.totalorder %v284_v62, 0 }
  0x42   :  { %v101_v1 = vsel %vm285_vm6, 0, %v284_v62 }
  0x43   :  { %v102_v2 = vsub.s32 32, %v101_v1  ;;  %v103_v4 = vshll.u32 %v94_v58, %v101_v1  ;;  %v106_v5 = vsub.s32 4294967266, %v101_v1 }
  0x45   :  { %v104_v6 = vshrl.u32 %v86_v63, %v102_v2  ;;  %v107_v7 = vadd.s32 127, %v106_v5 }
  0x47   :  { %v105_v9 = vor.u32 %v104_v6, %v103_v4  ;;  %v108_v10 = vshll.u32 %v107_v7, 23 }
  0x49   :  { %v109_v11 = vor.u32 4788187, %v108_v10  ;;  %v112_v12 = vcvt.s32.f32 %v105_v9 }
  0x4b   :  { %v110_v15 = vand.u32 2147483647, %v109_v11 }
  0x4d   :  { %v113_v17 = vmul.f32 %v112_v12, %v110_v15 }
  0x4f   :  { %v114_v20 = vxor.u32 2147483648, %v113_v17 }
  0x51   :  { %v115_v22 = vsel %vm32_vm7, %v114_v20, %v113_v17 }
  0x52   :  { %v118_v24 = vsel %vm31_vm8, %v399_v0, %v115_v22 }
  0x53   :  { %307 = vcosq.f32 %v118_v24 }
  0x54   :  { %309 = vsinq.f32 %v118_v24 }
  0x55   :  { %311 = vrsqrt.f32 %v242_v27 }
  0x5d   :  { %v308_v30 = vpop.eup %307 }
  0x5e   :  { %v310_v3 = vpop.eup %309  ;;  %v129_v31 = vxor.u32 2147483648, %v308_v30 }
  0x5f   :  { %v126_v32 = vxor.u32 2147483648, %v310_v3  ;;  %v312_v43 = vpop.eup %311 }
  0x60   :  { %v130_v33 = vsel %vm128_vm10, %v129_v31, %v310_v3  ;;  %v234_v34 = vsel %vm232_vm11, %v129_v31, %v310_v3 }
  0x61   :  { %v127_v35 = vsel %vm125_vm12, %v308_v30, %v126_v32  ;;  %v231_v36 = vsel %vm229_vm13, %v308_v30, %v126_v32 }
  0x62   :  { %v131_v37 = vsel %vm124_vm14, %v127_v35, %v130_v33  ;;  %v235_v38 = vsel %vm228_vm15, %v231_v36, %v234_v34 }
  0x63   :  { %v132_v39 = vsel %vm122_vm0, nan, %v131_v37  ;;  %v236_v40 = vsel %vm122_vm0, nan, %v235_v38 }
  0x64   :  { %v244_v41 = vmul.f32 %v290_v13, %v132_v39  ;;  %v245_v42 = vmul.f32 %v236_v40, %v27_v14 }
  0x66   :  { %v246_v44 = vadd.f32 %v245_v42, %v244_v41 }
  0x68   :  { %v247_v45 = vmul.f32 %v312_v43, %v246_v44 }
  0x6a   :  { %v248_v46 = vsel %vm241_vm9, %v247_v45, %v132_v39 }
  0x6b   :  { %v249_v47 = vmul.f32 50.0, %v248_v46 }
  0x6d   :  { %v291_v48 = vadd.f32 -1.837877, %v249_v47 }
  0x6f   :  { %v292_v50 = vadd.f32 -47.127575, %v291_v48 }
  0x71   :  { %v252_v0 = vmul.f32 1.442695, %v292_v50 }
  0x73   :  { %313 = vpow2.f32 %v252_v0 }
  0x74   :  { %315 = vpow2.f32 %v256_v51 }
  0x7d   :  { %v314_v52 = vpop.eup %313 }
  0x7e   :  { %v254_v53 = vmul.f32 0.85, %v314_v52  ;;  %v316_v54 = vpop.eup %315 }
  0x80   :  { %v255_v55 = vadd.f32 0.023873242, %v254_v53 }
  0x82   :  { %v258_v56 = vmul.f32 %v316_v54, %v255_v55 }
  0x84   :  { %v260_v57 = vsel %vm259_vm1, %v258_v56, 0.0 }
  0x85   :  { %261 = vadd.xlane.f32.xlu0 %v260_v57 }
 0x112   :  { %v262_v58 = vpop.xlane.xlu0 %261 }
 0x113   :  { %v263_v59 = vmax.f32 %v262_v58, 1e-08 }
 0x115   :  { %317 = vrcp.f32 %v263_v59 }
 0x11f   :  { %v318_v60 = vpop.eup %317 }
 0x120   :  { %v265_v61 = vmul.f32 %v318_v60, %v258_v56 }
 0x122   :  { %266 = vst [vmem:[#allocation5] sm:$0x3] %v265_v61 }
 0x123   :  { %352 = shalt.err (!%p349_p12)
}
 0x124   :  { %s353_s24 = scalar_lea.hbm %s435_s1, 32 }
 0x125   :  { %p354_p13 = scmp.ne.s32.totalorder %s435_s1, %s353_s24  ;;  %p357_p0 = scmp.lt.u32.totalorder %s353_s24, %s435_s1 }
 0x127   :  { %p359_p1 = pnand %p357_p0, %p354_p13 }
 0x129   :  { %362 = shalt.err (!%p359_p1)
}
 0x12a   :  { %276 = dma.vmem_to_hbm [thread:$0]  %s274_s20, 32, %s435_s1, [#allocation4]  }
 0x12b   :  { %365 = dma.done.wait [#allocation4], 32  }
 0x12c   :  { %366 = vsyncadd [#allocation4], 4294967264 }
 0x12d   :  { %280 = vsyncpa [#allocation3], 1 }
 0x12e   :  { %281 = vsyncpa [#allocation4], 1 }

</bundles_post_ra>
